<compile_context>
chip_gen: v6e
topology: v6e:2x2x1
jax: 0.10.0
libtpu: 0.0.40
codegen_flags: <defaults>
</compile_context>

<pallas_src>
import functools

import jax
import jax.numpy as jnp
from jax import lax
from jax.experimental import pallas as pl
from jax.experimental.pallas import tpu as pltpu


_SMALL_PROBLEM_BYTES = 4 * 1024 * 1024        # below this, block (most of) the batch per step
_FALLBACK_VMEM_CAPACITY = 64 * 1024 * 1024    # conservative (v7x per-core VMEM)


def _vmem_budgets():
    """Generation-aware (tile working-set budget, vmem_limit_bytes)."""
    cap = None
    try:
        cap = int(pltpu.get_tpu_info().vmem_capacity_bytes)
    except Exception:
        cap = None
    if not cap or cap <= 0:
        cap = _FALLBACK_VMEM_CAPACITY
    tile_budget = cap // 2                                  # ~32 MiB v7x, ~64 MiB v5e/v6e
    vmem_limit = min(int(cap * 0.8), cap - 8 * 1024 * 1024)  # ~51 MiB v7x, ~102 MiB v5e/v6e
    return tile_budget, int(vmem_limit)


def _sublane_multiple(dtype):
    # Packed sublanes per vreg row: 8 for 4-byte dtypes, 16 for bf16, 32 for 1-byte dtypes.
    return max(8, 32 // jnp.dtype(dtype).itemsize)


def _working_set_bytes(bb, tq, lk, d, dv, in_bytes, out_bytes, kv_buffers):
    """Approximate VMEM working set for one grid step."""
    kv = kv_buffers * bb * lk * (d + dv) * in_bytes           # resident K, V
    per_step = bb * (tq * d * in_bytes                         # q tile
                     + tq * dv * out_bytes                     # out tile
                     + 3 * tq * lk * out_bytes)                # attn / log_attn / raw tiles
    f32_live = 3 * bb * tq * lk * 4                            # live f32 intermediates
    return kv + 2 * per_step + f32_live                        # q/out tiles are double-buffered


def _choose_blocks(B, lq, lk, d, dv, in_bytes, out_bytes, sub, tile_budget,
                   block_b, block_q):
    auto_q = block_q is None

    if block_b is None:
        whole = _working_set_bytes(B, lq, lk, d, dv, in_bytes, out_bytes, 2)
        if whole <= _SMALL_PROBLEM_BYTES and B >= 2:
            # Small problem: block most of the batch to amortize per-step overhead,
            # but keep >= 2 grid steps so both v7x TensorCores get work.
            target = max(1, B // 2)
            block_b = max(t for t in range(1, target + 1) if B % t == 0)
        else:
            block_b = 1

    if auto_q:
        def fits(t):
            kvb = 1 if t < lq else 2     # K/V single-buffered when reused across q tiles
            return _working_set_bytes(block_b, t, lk, d, dv, in_bytes, out_bytes,
                                      kvb) <= tile_budget

        if fits(lq):
            block_q = lq
        else:
            block_q = None
            # Prefer MXU/lane-aligned 256- or 128-multiples, then the dtype
            # sublane multiple; prefer exact divisors of Lq, then any aligned
            # tile (handled with a cdiv grid + padded last tile).
            steps = [s for s in (256, 128, sub) if s <= lq]
            for require_divisor in (True, False):
                if block_q is not None:
                    break
                for step in steps:
                    top = (min(lq, 2048) // step) * step
                    for t in range(top, step - 1, -step):
                        if require_divisor and lq % t != 0:
                            continue
                        if fits(t):
                            block_q = t
                            break
                    if block_q is not None:
                        break
            if block_q is None:
                block_q = sub   # minimal aligned tile; may exceed the soft budget for extreme Lk

        # Whole problem in one grid step: split the query axis so a second
        # TensorCore (v7x) still gets work.
        if B // block_b == 1 and block_q == lq and lq >= 2 * sub and (lq // 2) % sub == 0:
            block_q = lq // 2

    return block_b, block_q


def _sdpa_kernel(q_ref, k_ref, v_ref,
                 out_ref, attn_ref, log_attn_ref, raw_ref,
                 *, inv_temperature):
    q = q_ref[...]                               # (bb, tq, D)
    k = k_ref[...]                               # (bb, Lk, D)
    v = v_ref[...]                               # (bb, Lk, Dv)

    # scores = (q @ k^T) / temperature -- contraction on the last dims (no k.T),
    # MXU fed in the input dtype with f32 accumulation; temperature applied to
    # the f32 scores so low-precision inputs still match the torch reference.
    scores = lax.dot_general(
        q, k,
        dimension_numbers=(((2,), (2,)), ((0,), (0,))),
        preferred_element_type=jnp.float32,
    ) * inv_temperature                          # (bb, tq, Lk) f32
    raw_ref[...] = scores.astype(raw_ref.dtype)

    # Numerically stable softmax / log-softmax along the key axis (dim=2).
    m = jnp.max(scores, axis=-1, keepdims=True)
    shifted = scores - m
    e = jnp.exp(shifted)
    s = jnp.sum(e, axis=-1, keepdims=True)
    log_attn = shifted - jnp.log(s)              # == scores - logsumexp
    attn = jnp.exp(log_attn)                     # EUP exp instead of a VPU e*(1/s) pass

    attn_ref[...] = attn.astype(attn_ref.dtype)
    log_attn_ref[...] = log_attn.astype(log_attn_ref.dtype)

    # TODO(synk): nn.Dropout(0.1) is identity in eval mode; training-mode dropout
    # (pltpu.prng_seed + pltpu.stateful_bernoulli mask) is intentionally omitted.

    # output = attn @ v, MXU in v's dtype with f32 accumulation.
    out = lax.dot_general(
        attn.astype(v.dtype), v,
        dimension_numbers=(((2,), (1,)), ((0,), (0,))),
        preferred_element_type=jnp.float32,
    )                                            # (bb, tq, Dv)
    out_ref[...] = out.astype(out_ref.dtype)


def scaled_dot_product_attention(q, k, v, temperature, *,
                                 block_b=None, block_q=None):
    B, Lq, D = q.shape
    Bk, Lk, Dk = k.shape
    Bv, Lkv, Dv = v.shape
    assert (B, D) == (Bk, Dk) and (B, Lk) == (Bv, Lkv), "inconsistent q/k/v shapes"

    out_dtype = q.dtype
    in_bytes = jnp.dtype(q.dtype).itemsize
    out_bytes = jnp.dtype(out_dtype).itemsize
    sub = _sublane_multiple(q.dtype)

    tile_budget, vmem_limit = _vmem_budgets()
    block_b, block_q = _choose_blocks(B, Lq, Lk, D, Dv, in_bytes, out_bytes, sub,
                                      tile_budget, block_b, block_q)
    assert B % block_b == 0, "block_b must divide the batch"
    assert block_q == Lq or block_q % 8 == 0, \
        "block_q must be a multiple of 8 (16 preferred for bf16) or equal Lq"

    num_b_blocks = B // block_b
    num_q_blocks = pl.cdiv(Lq, block_q)          # padded last query tile tolerated
    grid = (num_b_blocks, num_q_blocks)

    # K/V are reused across the query-tile axis; single-buffer them when that
    # axis has more than one step (halves the largest resident VMEM term; one
    # exposed K/V DMA per batch block is negligible).
    kv_kwargs = dict(pipeline_mode=pl.Buffered(1)) if num_q_blocks > 1 else {}

    kernel = functools.partial(_sdpa_kernel,
                               inv_temperature=1.0 / float(temperature))

    out_shapes = (
        jax.ShapeDtypeStruct((B, Lq, Dv), out_dtype),   # output
        jax.ShapeDtypeStruct((B, Lq, Lk), out_dtype),   # attn (post-softmax)
        jax.ShapeDtypeStruct((B, Lq, Lk), out_dtype),   # log_attn
        jax.ShapeDtypeStruct((B, Lq, Lk), out_dtype),   # raw_attn
    )

    grid_spec = pltpu.PrefetchScalarGridSpec(
        num_scalar_prefetch=0,
        grid=grid,
        in_specs=[
            pl.BlockSpec((block_b, block_q, D), lambda b, qi: (b, qi, 0)),
            pl.BlockSpec((block_b, Lk, D), lambda b, qi: (b, 0, 0), **kv_kwargs),
            pl.BlockSpec((block_b, Lk, Dv), lambda b, qi: (b, 0, 0), **kv_kwargs),
        ],
        out_specs=[
            pl.BlockSpec((block_b, block_q, Dv), lambda b, qi: (b, qi, 0)),
            pl.BlockSpec((block_b, block_q, Lk), lambda b, qi: (b, qi, 0)),
            pl.BlockSpec((block_b, block_q, Lk), lambda b, qi: (b, qi, 0)),
            pl.BlockSpec((block_b, block_q, Lk), lambda b, qi: (b, qi, 0)),
        ],
    )

    return pl.pallas_call(
        kernel,
        out_shape=out_shapes,
        grid_spec=grid_spec,
        compiler_params=pltpu.CompilerParams(
            dimension_semantics=("parallel", "parallel"),
            vmem_limit_bytes=vmem_limit,
        ),
    )(q, k, v)


def _reference(q, k, v, temperature):
    scores = jnp.einsum("bqd,bkd->bqk", q, k) / temperature
    raw = scores
    log_attn = jax.nn.log_softmax(scores, axis=2)
    sm = jax.nn.softmax(scores, axis=2)
    out = jnp.einsum("bqk,bkd->bqd", sm, v)
    return (out.astype(q.dtype), sm.astype(q.dtype),
            log_attn.astype(q.dtype), raw.astype(q.dtype))


def _check(name, got, want):
    assert jnp.allclose(got, want, atol=2e-5, rtol=1e-5), f"{name} mismatch"


if __name__ == "__main__":
    # Case 1: small shapes consistent with the module (batch=2, seq=8, hidden=32),
    # auto block selection (small-problem path, >= 2 parallel grid steps).
    kq, kk, kv = jax.random.split(jax.random.PRNGKey(0), 3)
    B, Lq, Lk, D, Dv = 2, 8, 8, 32, 32
    temperature = float(D) ** 0.5  # typical sqrt(d_k)
    q = jax.random.normal(kq, (B, Lq, D), dtype=jnp.float32)
    k = jax.random.normal(kk, (B, Lk, D), dtype=jnp.float32)
    v = jax.random.normal(kv, (B, Lk, Dv), dtype=jnp.float32)

    outs = jax.block_until_ready(scaled_dot_product_attention(q, k, v, temperature))
    refs = _reference(q, k, v, temperature)
    for name, got, want in zip(("output", "attn", "log_attn", "raw_attn"), outs, refs):
        _check(name, got, want)

    # Case 2: exercise the tiled path (batch grid axis + query-tile grid axis,
    # K/V resident and single-buffered across query tiles).
    kq2, kk2, kv2 = jax.random.split(jax.random.PRNGKey(1), 3)
    B2, Lq2, Lk2, D2, Dv2 = 2, 128, 128, 64, 32
    temperature2 = float(D2) ** 0.5
    q2 = jax.random.normal(kq2, (B2, Lq2, D2), dtype=jnp.float32)
    k2 = jax.random.normal(kk2, (B2, Lk2, D2), dtype=jnp.float32)
    v2 = jax.random.normal(kv2, (B2, Lk2, Dv2), dtype=jnp.float32)

    outs2 = jax.block_until_ready(
        scaled_dot_product_attention(q2, k2, v2, temperature2, block_b=1, block_q=64))
    refs2 = _reference(q2, k2, v2, temperature2)
    for name, got, want in zip(("output", "attn", "log_attn", "raw_attn"), outs2, refs2):
        _check(name, got, want)

    print("KERNEL_OK")
</pallas_src>

<mosaic_0001>
module attributes {stable_mosaic.version = 11 : i64} {
  func.func @_sdpa_kernel(%arg0: i32, %arg1: i32, %arg2: memref<1x8x32xf32, #tpu.memory_space<vmem>>, %arg3: memref<1x8x32xf32, #tpu.memory_space<vmem>>, %arg4: memref<1x8x32xf32, #tpu.memory_space<vmem>>, %arg5: memref<1x8x32xf32, #tpu.memory_space<vmem>>, %arg6: memref<1x8x8xf32, #tpu.memory_space<vmem>>, %arg7: memref<1x8x8xf32, #tpu.memory_space<vmem>>, %arg8: memref<1x8x8xf32, #tpu.memory_space<vmem>>) attributes {dimension_semantics = [#tpu.dimension_semantics<parallel>, #tpu.dimension_semantics<parallel>], iteration_bounds = array<i64: 2, 1>, scalar_prefetch = 0 : i64, scratch_operands = 0 : i64, tpu.core_type = #tpu.core_type<tc>, window_params = [{transform_indices = @transform_0, window_bounds = array<i64: 1, 8, 32>}, {transform_indices = @transform_1, window_bounds = array<i64: 1, 8, 32>}, {transform_indices = @transform_2, window_bounds = array<i64: 1, 8, 32>}, {transform_indices = @transform_3, window_bounds = array<i64: 1, 8, 32>}, {transform_indices = @transform_4, window_bounds = array<i64: 1, 8, 8>}, {transform_indices = @transform_5, window_bounds = array<i64: 1, 8, 8>}, {transform_indices = @transform_6, window_bounds = array<i64: 1, 8, 8>}]} {
    %c0 = arith.constant 0 : index
    %c0_0 = arith.constant 0 : index
    %c0_1 = arith.constant 0 : index
    %0 = vector.load %arg2[%c0, %c0_0, %c0_1] : memref<1x8x32xf32, #tpu.memory_space<vmem>>, vector<1x8x32xf32>
    %c0_2 = arith.constant 0 : index
    %c0_3 = arith.constant 0 : index
    %c0_4 = arith.constant 0 : index
    %1 = vector.load %arg3[%c0_2, %c0_3, %c0_4] : memref<1x8x32xf32, #tpu.memory_space<vmem>>, vector<1x8x32xf32>
    %c0_5 = arith.constant 0 : index
    %c0_6 = arith.constant 0 : index
    %c0_7 = arith.constant 0 : index
    %2 = vector.load %arg4[%c0_5, %c0_6, %c0_7] : memref<1x8x32xf32, #tpu.memory_space<vmem>>, vector<1x8x32xf32>
    %cst = arith.constant dense<0.000000e+00> : vector<1x8x8xf32>
    %3 = tpu.matmul %0, %1, %cst {dimension_numbers = #tpu.dot_dimension_numbers<[2], [2], [1], [1], [0, 0, 0, 1, 1, 1], [0], [0]>} : vector<1x8x32xf32>, vector<1x8x32xf32>, vector<1x8x8xf32> -> vector<1x8x8xf32>
    %cst_8 = arith.constant 0.176776692 : f32
    %4 = vector.broadcast %cst_8 : f32 to vector<1x8x8xf32>
    %5 = arith.mulf %3, %4 : vector<1x8x8xf32>
    %c0_9 = arith.constant 0 : index
    %c0_10 = arith.constant 0 : index
    %c0_11 = arith.constant 0 : index
    %6 = vector.load %arg8[%c0_9, %c0_10, %c0_11] : memref<1x8x8xf32, #tpu.memory_space<vmem>>, vector<1x8x8xf32>
    tpu.vector_store %arg8[%c0_9, %c0_10, %c0_11], %5 {strides = array<i32>} : memref<1x8x8xf32, #tpu.memory_space<vmem>>, vector<1x8x8xf32>,
    %cst_12 = arith.constant dense<0xFF800000> : vector<1x8xf32>
    %7 = vector.multi_reduction <maximumf>, %5, %cst_12 [2] : vector<1x8x8xf32> to vector<1x8xf32>
    %8 = vector.shape_cast %7 : vector<1x8xf32> to vector<1x8x1xf32>
    %9 = vector.broadcast %8 : vector<1x8x1xf32> to vector<1x8x8xf32>
    %10 = arith.subf %5, %9 : vector<1x8x8xf32>
    %11 = math.exp %10 : vector<1x8x8xf32>
    %cst_13 = arith.constant dense<0.000000e+00> : vector<1x8xf32>
    %12 = vector.multi_reduction <add>, %11, %cst_13 [2] : vector<1x8x8xf32> to vector<1x8xf32>
    %13 = vector.shape_cast %12 : vector<1x8xf32> to vector<1x8x1xf32>
    %14 = math.log %13 : vector<1x8x1xf32>
    %15 = vector.broadcast %14 : vector<1x8x1xf32> to vector<1x8x8xf32>
    %16 = arith.subf %10, %15 : vector<1x8x8xf32>
    %17 = math.exp %16 : vector<1x8x8xf32>
    %c0_14 = arith.constant 0 : index
    %c0_15 = arith.constant 0 : index
    %c0_16 = arith.constant 0 : index
    %18 = vector.load %arg6[%c0_14, %c0_15, %c0_16] : memref<1x8x8xf32, #tpu.memory_space<vmem>>, vector<1x8x8xf32>
    tpu.vector_store %arg6[%c0_14, %c0_15, %c0_16], %17 {strides = array<i32>} : memref<1x8x8xf32, #tpu.memory_space<vmem>>, vector<1x8x8xf32>,
    %c0_17 = arith.constant 0 : index
    %c0_18 = arith.constant 0 : index
    %c0_19 = arith.constant 0 : index
    %19 = vector.load %arg7[%c0_17, %c0_18, %c0_19] : memref<1x8x8xf32, #tpu.memory_space<vmem>>, vector<1x8x8xf32>
    tpu.vector_store %arg7[%c0_17, %c0_18, %c0_19], %16 {strides = array<i32>} : memref<1x8x8xf32, #tpu.memory_space<vmem>>, vector<1x8x8xf32>,
    %cst_20 = arith.constant dense<0.000000e+00> : vector<1x8x32xf32>
    %20 = tpu.matmul %17, %2, %cst_20 {dimension_numbers = #tpu.dot_dimension_numbers<[2], [1], [1], [2], [0, 0, 0, 1, 1, 2], [0], [0]>} : vector<1x8x8xf32>, vector<1x8x32xf32>, vector<1x8x32xf32> -> vector<1x8x32xf32>
    %c0_21 = arith.constant 0 : index
    %c0_22 = arith.constant 0 : index
    %c0_23 = arith.constant 0 : index
    %21 = vector.load %arg5[%c0_21, %c0_22, %c0_23] : memref<1x8x32xf32, #tpu.memory_space<vmem>>, vector<1x8x32xf32>
    tpu.vector_store %arg5[%c0_21, %c0_22, %c0_23], %20 {strides = array<i32>} : memref<1x8x32xf32, #tpu.memory_space<vmem>>, vector<1x8x32xf32>,
    return
  }
  func.func @transform_0(%arg0: i32, %arg1: i32) -> (i32, i32, i32) {
    %c0_i32 = arith.constant 0 : i32
    %c0_i32_0 = arith.constant 0 : i32
    return %arg0, %arg1, %c0_i32 : i32, i32, i32
  }
  func.func @transform_1(%arg0: i32, %arg1: i32) -> (i32, i32, i32) {
    %c0_i32 = arith.constant 0 : i32
    %c0_i32_0 = arith.constant 0 : i32
    %c0_i32_1 = arith.constant 0 : i32
    return %arg0, %c0_i32, %c0_i32_0 : i32, i32, i32
  }
  func.func @transform_2(%arg0: i32, %arg1: i32) -> (i32, i32, i32) {
    %c0_i32 = arith.constant 0 : i32
    %c0_i32_0 = arith.constant 0 : i32
    %c0_i32_1 = arith.constant 0 : i32
    return %arg0, %c0_i32, %c0_i32_0 : i32, i32, i32
  }
  func.func @transform_3(%arg0: i32, %arg1: i32) -> (i32, i32, i32) {
    %c0_i32 = arith.constant 0 : i32
    %c0_i32_0 = arith.constant 0 : i32
    return %arg0, %arg1, %c0_i32 : i32, i32, i32
  }
  func.func @transform_4(%arg0: i32, %arg1: i32) -> (i32, i32, i32) {
    %c0_i32 = arith.constant 0 : i32
    %c0_i32_0 = arith.constant 0 : i32
    return %arg0, %arg1, %c0_i32 : i32, i32, i32
  }
  func.func @transform_5(%arg0: i32, %arg1: i32) -> (i32, i32, i32) {
    %c0_i32 = arith.constant 0 : i32
    %c0_i32_0 = arith.constant 0 : i32
    return %arg0, %arg1, %c0_i32 : i32, i32, i32
  }
  func.func @transform_6(%arg0: i32, %arg1: i32) -> (i32, i32, i32) {
    %c0_i32 = arith.constant 0 : i32
    %c0_i32_0 = arith.constant 0 : i32
    return %arg0, %arg1, %c0_i32 : i32, i32, i32
  }
}

</mosaic_0001>

<bundles_post_ra>
// kernel: tpu_custom_call.1
= control target key start
LH: loop header
LB: loop body
LE: loop exit
PB: predicated region body
PF: predicated region fallthrough
CT: control target
= control target key end

     0   :  { %s1593_s0 = inlined_call_operand.hbm [shape: f32[2,8,32], index: 0, kind: input, shape index: {}]   ;;  %s1594_s1 = inlined_call_operand.hbm [shape: f32[2,8,32], index: 1, kind: input, shape index: {}]   ;;  %s1595_s2 = inlined_call_operand.hbm [shape: f32[2,8,32], index: 2, kind: input, shape index: {}]   ;;  %s1596_s3 = inlined_call_operand.hbm [shape: f32[2,8,32], index: 3, kind: output, shape index: {0}]   ;;  %s1597_s4 = inlined_call_operand.hbm [shape: f32[2,8,8], index: 4, kind: output, shape index: {1}]   ;;  %s1598_s5 = inlined_call_operand.hbm [shape: f32[2,8,8], index: 5, kind: output, shape index: {2}]   ;;  %s1599_s6 = inlined_call_operand.hbm [shape: f32[2,8,8], index: 6, kind: output, shape index: {3}]  }
   0x1   :  { %1607 = sst [smem:[#allocation24_spill]] %s1594_s1 }
   0x2   :  { %12 = vsyncpa [#allocation3], 0 }
   0x3   :  { %14 = vsyncpa [#allocation3 + $0x1], 0 }
   0x4   :  { %15 = vsyncpa [#allocation6], 0 }
   0x5   :  { %17 = vsyncpa [#allocation6 + $0x1], 0 }
   0x6   :  { %18 = vsyncpa [#allocation4], 0 }
   0x7   :  { %20 = vsyncpa [#allocation4 + $0x1], 0 }
   0x8   :  { %21 = vsyncpa [#allocation10], 0 }
   0x9   :  { %23 = vsyncpa [#allocation10 + $0x1], 0 }
   0xa   :  { %24 = vsyncpa [#allocation13], 0 }
   0xb   :  { %26 = vsyncpa [#allocation13 + $0x1], 0  ;;  %s1293_s21 = smov 0   ;;  %s1295_s22 = smov 0  }
   0xc   :  { %s1297_s23 = smov 0   ;;  %s1299_s24 = smov 0  }
   0xd   :  { %s1301_s25 = smov 0   ;;  %s1303_s26 = smov 0  }
   0xe LB: > { %1608 = sst [smem:[#allocation19_spill]] %s1243_s25  ;;  %s1324_s27 = sadd.s32 4294967295, %s1247_s26   ;;  %s1247_s26 = sphi %s1303_s26, %s32_s26   ;;  %s1243_s25 = sphi %s1301_s25, %s1627_s25   ;;  %s1239_s24 = sphi %s1299_s24, %s1626_s24   ;;  %s1235_s23 = sphi %s1297_s23, %s1630_s23   ;;  %s1231_s22 = sphi %s1295_s22, %s1629_s22   ;;  %s1227_s21 = sphi %s1293_s21, %s1628_s21  }
   0xf   : > { %1609 = sst [smem:[#allocation20_spill]] %s1247_s26  ;;  %s1600_s28 = sadd.s32 4294967294, %s1247_s26  }
  0x10   : > { %s44_s29 = sadd.s32 1, %s1243_s25  ;;  %s53_s30 = sadd.s32 1, %s1235_s23 }
  0x11   : > { %p46_p0 = scmp.ge.s32.totalorder %s44_s29, 2  ;;  %p60_p1 = scmp.ne.s32.totalorder %s1235_s23, %s1231_s22 }
  0x12   : > { %p61_p2 = scmp.eq.s32.totalorder %s1247_s26, 0  ;;  %p66_p3 = scmp.ne.s32.totalorder %s1231_s22, %s1227_s21 }
  0x13   : > { %s1632_s29 = smov (%p46_p0, %s44_s29), 0  ;;  %p67_p5 = scmp.eq.s32.totalorder %s1324_s27, 0 }
  0x14   : > { %1610 = sst [smem:[#allocation21_spill]] %s1632_s29  ;;  %p1336_p4 = por %p61_p2, %p60_p1 }
  0x15   : > { %s48_s8 = ssub.s32 %s1243_s25, %s1632_s29  ;;  %p144_p6 = scmp.eq.s32.totalorder %s1324_s27, 1 }
  0x16   : > { %p51_p7 = scmp.eq.s32.totalorder %s48_s8, 0  ;;  %p1344_p8 = por %p67_p5, %p66_p3 }
  0x17   : > { %p1348_p9 = por %p144_p6, %p60_p1  ;;  %p150_p10 = scmp.eq.s32.totalorder %s1600_s28, 1 }
  0x18   : > { %s1355_s11 = scalar_select %p51_p7, %s1235_s23, %s53_s30  }
  0x19   : > { %p1357_p11 = por %p150_p10, %p66_p3  ;;  %p935_p13 = scmp.lt.s32.totalorder %s1247_s26, 2 }
  0x1a   : > { %1614 = sst [smem:[#allocation22_spill]] %s1355_s11  ;;  %s1601_s13 = sand.u32 1, %s1235_s23  }
  0x1b   : > { %s1615_s12 = scalar_select %p1357_p11, 1, 0 }
  0x1c   : > { %s1366_s14 = sshll.u32 %s1601_s13, 3  ;;  %s1369_s15 = sshll.u32 %s1243_s25, 7 }
  0x1d   : > { %1616 = sst [smem:[#allocation23_spill]] %s1615_s12  ;;  %p1373_p0 = pnand %p935_p13, %p1336_p4 }
  0x1e   : > { %s273_s17 = sand.u32 1, %s1247_s26   ;;  %s1618_s1 = sld [smem:[#allocation24_spill]] }
  0x1f   : > { %s277_s30 = scalar_lea.vmem [#allocation5], %s1366_s14  ;;  %p863_p1 = scmp.ge.s32.totalorder %s1247_s26, 1 }
  0x20   : > { %s284_s8 = sshll.u32 %s277_s30, 4  ;;  %p307_p2 = scmp.lt.s32.totalorder %s1247_s26, 3  ;;  %s285_s8 = int_to_ptr.vmem [resolvable:$true] %s284_s8 }
  0x21   : > { %s1385_s28 = scalar_lea.sflag [#allocation6], %s273_s17  ;;  %p995_p3 = pneg %p1373_p0 }
  0x22   : > { %s1006_s7 = scalar_lea.vmem %s285_s8, 128  ;;  %s1249_s13 = smov [#allocation5]  }
  0x23   : > { %p1007_p4 = scmp.ne.s32.totalorder %s285_s8, %s1006_s7  ;;  %s1011_s29 = sshll.u32 %s1249_s13, 4  ;;  %s1012_s29 = int_to_ptr.vmem [resolvable:$false] %s1011_s29 }
  0x24   : > { %s282_s20 = scalar_lea.hbm %s1618_s1, %s1369_s15  ;;  %s1013_s18 = scalar_lea.vmem %s1012_s29, 256 }
  0x25   : > { %p1009_p5 = pnand %p1007_p4, %p995_p3  ;;  %p1014_p7 = scmp.lt.s32.totalorder %s285_s8, %s1012_s29 }
  0x26   : > { %p1015_p10 = scmp.lt.s32.totalorder %s1013_s18, %s1006_s7 }
  0x27   : > { %p1010_p6 = pneg %p1009_p5 }
  0x28   : > { %p1016_p13 = por %p1015_p10, %p1014_p7 }
  0x2a   : > { %p1017_p12 = pnand %p1016_p13, %p1010_p6 }
  0x2c   : > { %1020 = shalt.err (!%p1017_p12)
}
  0x2d   : > { %918 = dma.hbm_to_vmem [thread:$0]  (!%p1373_p0), %s282_s20, 128, %s285_s8, %s1385_s28  }
  0x2e   : > { %p1399_p4 = pnand %p863_p1, %p307_p2  ;;  %s264_s19 = scalar_lea.hbm %s1593_s0, %s1369_s15 }
  0x2f   : > { %s258_s30 = scalar_lea.vmem [#allocation2], %s1366_s14  ;;  %s300_s25 = scalar_lea.hbm %s1595_s2, %s1369_s15 }
  0x30   : > { %s266_s7 = sshll.u32 %s258_s30, 4  ;;  %s1620_s11 = sand.u32 1, %s1235_s23   ;;  %s267_s7 = int_to_ptr.vmem [resolvable:$true] %s266_s7 }
  0x31   : > { %s255_s12 = scalar_lea.sflag [#allocation3], %s1620_s11  ;;  %s1034_s20 = scalar_lea.vmem %s267_s7, 128 }
  0x32   : > { %p1035_p12 = scmp.ne.s32.totalorder %s267_s7, %s1034_s20  ;;  %s1250_s8 = smov [#allocation2]  }
  0x33   : > { %s1039_s26 = sshll.u32 %s1250_s8, 4  ;;  %s1040_s26 = int_to_ptr.vmem [resolvable:$false] %s1039_s26 }
  0x34   : > { %p1037_p1 = pnand %p1035_p12, %p995_p3  ;;  %s1041_s29 = scalar_lea.vmem %s1040_s26, 256 }
  0x35   : > { %p1042_p5 = scmp.lt.s32.totalorder %s267_s7, %s1040_s26  ;;  %p1043_p6 = scmp.lt.s32.totalorder %s1041_s29, %s1034_s20 }
  0x36   : > { %p1038_p2 = pneg %p1037_p1 }
  0x37   : > { %p1044_p7 = por %p1043_p6, %p1042_p5 }
  0x39   : > { %p1045_p10 = pnand %p1044_p7, %p1038_p2 }
  0x3b   : > { %1048 = shalt.err (!%p1045_p10)
}
  0x3c   : > { %915 = dma.hbm_to_vmem [thread:$0]  (!%p1373_p0), %s264_s19, 128, %s267_s7, %s255_s12  }
  0x3d   : > { %s295_s1 = scalar_lea.vmem [#allocation7], %s1366_s14  ;;  %s1251_s30 = smov [#allocation7]  }
  0x3e   : > { %s302_s11 = sshll.u32 %s295_s1, 4  ;;  %s1067_s26 = sshll.u32 %s1251_s30, 4  ;;  %s303_s11 = int_to_ptr.vmem [resolvable:$true] %s302_s11  ;;  %s1068_s26 = int_to_ptr.vmem [resolvable:$false] %s1067_s26 }
  0x3f   : > { %s1062_s17 = scalar_lea.vmem %s303_s11, 128  ;;  %s1069_s18 = scalar_lea.vmem %s1068_s26, 256 }
  0x40   : > { %p1063_p13 = scmp.ne.s32.totalorder %s303_s11, %s1062_s17  ;;  %p1070_p2 = scmp.lt.s32.totalorder %s303_s11, %s1068_s26 }
  0x41   : > { %p1071_p5 = scmp.lt.s32.totalorder %s1069_s18, %s1062_s17 }
  0x42   : > { %p1065_p12 = pnand %p1063_p13, %p995_p3 }
  0x43   : > { %p1072_p6 = por %p1071_p5, %p1070_p2 }
  0x44   : > { %p1066_p1 = pneg %p1065_p12 }
  0x46   : > { %p1073_p7 = pnand %p1072_p6, %p1066_p1 }
  0x48   : > { %1076 = shalt.err (!%p1073_p7)
}
  0x49   : > { %921 = dma.hbm_to_vmem [thread:$0]  (!%p1373_p0), %s300_s25, 128, %s303_s11, %s1385_s28  }
  0x4a   : > { %311 = sbr.rel (%p1399_p4) target bundleno = 821 (0x335), region = 32  ;;  %s1434_s19 = sand.u32 (!%p1399_p4), 1, %s1231_s22  }
  0x4b   : > { %s1437_s7 = sshll.u32 (!%p1399_p4), %s1434_s19, 3  ;;  %s314_s16 = scalar_lea.sflag (!%p1399_p4), [#allocation3], %s1434_s19 }
  0x4c   : > { %s317_s20 = scalar_lea.vmem (!%p1399_p4), [#allocation2], %s1437_s7 }
  0x4f   : > { %1206 = dma.done.wait (%p1344_p8), %s314_s16, 128  }
  0x50   : > { %1208 = vsyncadd (%p1344_p8), %s314_s16, 4294967168  ;;  %s322_s25 = sand.u32 1, %s1324_s27   ;;  %s326_s15 = scalar_lea.vmem [#allocation5], %s1437_s7 }
  0x51   : > { %s323_s28 = scalar_lea.sflag [#allocation6], %s322_s25 }
  0x52   : > { %1210 = dma.done.wait (%p1344_p8), %s323_s28, 256  }
  0x53   : > { %1212 = vsyncadd (%p1344_p8), %s323_s28, 4294967040  ;;  %v1252_v0 = vmov 0.0   ;;  %vm1253_vm0 = vmmov 0   ;;  %vm392_vm1 = vcmask 261120   ;;  %v390_v1 = vld [vmem:[%s326_s15] sm:$0xff]  ;;  %v389_v2 = vld [vmem:[%s317_s20] sm:$0xff] }
  0x54   : > { %888 = vmatprep.subr.mxu0 %v1252_v0  ;;  %890 = vmatprep.mubr.msk.f32.mxu0 %vm1253_vm0, %v1252_v0  ;;  %vm470_vm2 = vcmask 64512   ;;  %s388_s9 = scalar_lea.vmem [#allocation12], %s1437_s7  ;;  %s335_s13 = scalar_lea.vmem [#allocation7], %s1437_s7 }
  0x55   : > { %893 = vmatprep.subr.mxu1 %v1252_v0  ;;  %895 = vmatprep.mubr.msk.f32.mxu1 %vm1253_vm0, %v1252_v0  ;;  %v391_v12 = vld [vmem:[%s335_s13] sm:$0xff]  ;;  %s381_s8 = scalar_lea.vmem [#allocation11], %s1437_s7  ;;  %s374_s29 = scalar_lea.vmem [#allocation9], %s1437_s7 }
  0x56   : > { %889 = vmatpush3.xpose.msk.msra.mxu0 %vm392_vm1, %v390_v1  ;;  %894 = vmatpush3.msra.mxu1 %v391_v12  ;;  %s1470_s1 = sshll.u32 %s1239_s24, 7  ;;  %s606_s11 = sshll.u32 %s374_s29, 4  ;;  %s607_s11 = int_to_ptr.vmem [resolvable:$true] %s606_s11 }
  0x57   : > { %s604_s26 = scalar_lea.hbm %s1597_s4, %s1470_s1  ;;  %s1478_s18 = scalar_lea.sflag [#allocation10], %s322_s25 }
  0x58   : > { %s1077_s12 = scalar_lea.vmem %s607_s11, 128  ;;  %s1254_s14 = smov [#allocation9]  }
  0x59   : > { %891 = vmatmul.mubr.msk.f32.vlgmr.msra.gmra.mxu0 %vm392_vm1, %v389_v2  ;;  %p1078_p8 = scmp.ne.s32.totalorder %s607_s11, %s1077_s12  ;;  %s1081_s16 = sshll.u32 %s1254_s14, 4  ;;  %s1082_s16 = int_to_ptr.vmem [resolvable:$false] %s1081_s16 }
  0x5a   : > { %s1083_s24 = scalar_lea.vmem %s1082_s16, 256  ;;  %p1084_p4 = scmp.lt.s32.totalorder %s607_s11, %s1082_s16 }
  0x5b   : > { %p1079_p0 = pnand %p1078_p8, %p1348_p9  ;;  %p1085_p10 = scmp.lt.s32.totalorder %s1083_s24, %s1077_s12 }
  0x5d   : > { %p1080_p3 = pneg %p1079_p0  ;;  %p1086_p13 = por %p1085_p10, %p1084_p4 }
  0x5f   : > { %p1087_p12 = pnand %p1086_p13, %p1080_p3 }
 0x119   : > { %v465_v3 = vpop.f32.mrf.mxu0 }
 0x11a   : > { %v469_v4 = vmul.f32 0.17677669, %v465_v3 }
 0x11b   : > { %v892_v5 = vpop.f32.mrf.mxu0 }
 0x11c   : > { %v472_v6 = vsel %vm470_vm2, %v469_v4, -inf  ;;  %471 = vst.msk [vmem:[%s388_s9] sm:$0xff] %vm470_vm2, %v469_v4 }
 0x11d   : > { %473 = vmax.xlane.f32.xlu0 %v472_v6 }
 0x1a6   : > { %v474_v7 = vpop.xlane.xlu0 %473 }
 0x1a7   : > { %v475_v8 = vsub.f32 %v469_v4, %v474_v7 }
 0x1a9   : > { %v476_v9 = vmul.f32 1.442695, %v475_v8 }
 0x1ab   : > { %987 = vpow2.f32 %v476_v9 }
 0x1b8   : > { %v988_v10 = vpop.eup %987 }
 0x1b9   : > { %v478_v11 = vsel %vm470_vm2, %v988_v10, 0.0 }
 0x1ba   : > { %479 = vadd.xlane.f32.xlu0 %v478_v11 }
 0x243   : > { %v480_v13 = vpop.xlane.xlu0 %479 }
 0x244   : > { %989 = vlog2.f32 %v480_v13 }
 0x251   : > { %v990_v14 = vpop.eup %989 }
 0x252   : > { %v482_v15 = vmul.f32 0.6931472, %v990_v14 }
 0x254   : > { %v483_v16 = vsub.f32 %v475_v8, %v482_v15 }
 0x256   : > { %v484_v17 = vmul.f32 1.442695, %v483_v16  ;;  %487 = vst.msk [vmem:[%s381_s8] sm:$0xff] %vm470_vm2, %v483_v16 }
 0x258   : > { %991 = vpow2.f32 %v484_v17 }
 0x265   : > { %v992_v18 = vpop.eup %991 }
 0x266   : > { %896 = vmatmul.mubr.msk.f32.vlgmr.msra.gmra.mxu1 %vm470_vm2, %v992_v18  ;;  %486 = vst.msk [vmem:[%s374_s29] sm:$0xff] %vm470_vm2, %v992_v18 }
 0x267   : > { %1090 = shalt.err (!%p1087_p12)
}
 0x268   : > { %s1091_s20 = scalar_lea.hbm %s604_s26, 128  ;;  %s1095_s28 = scalar_lea.hbm %s1597_s4, 256 }
 0x269   : > { %p1092_p1 = scmp.ne.s32.totalorder %s604_s26, %s1091_s20  ;;  %p1096_p6 = scmp.lt.s32.totalorder %s604_s26, %s1597_s4 }
 0x26a   : > { %p1097_p7 = scmp.lt.s32.totalorder %s1095_s28, %s1091_s20 }
 0x26b   : > { %p1093_p2 = pnand %p1092_p1, %p1348_p9 }
 0x26c   : > { %p1098_p8 = por %p1097_p7, %p1096_p6 }
 0x26d   : > { %p1094_p5 = pneg %p1093_p2 }
 0x26f   : > { %p1099_p0 = pnand %p1098_p8, %p1094_p5 }
 0x271   : > { %1102 = shalt.err (!%p1099_p0)
}
 0x272   : > { %905 = dma.vmem_to_hbm [thread:$0]  (%p1348_p9), %s607_s11, 128, %s604_s26, %s1478_s18  }
 0x273   : > { %s618_s30 = scalar_lea.hbm %s1598_s5, %s1470_s1  ;;  %s620_s12 = sshll.u32 %s381_s8, 4  ;;  %s621_s12 = int_to_ptr.vmem [resolvable:$true] %s620_s12 }
 0x274   : > { %s1503_s24 = scalar_lea.hbm %s1599_s6, %s1470_s1  ;;  %s1103_s20 = scalar_lea.vmem %s621_s12, 128 }
 0x275   : > { %p1104_p3 = scmp.ne.s32.totalorder %s621_s12, %s1103_s20  ;;  %s1255_s27 = smov [#allocation11]  }
 0x276   : > { %s1107_s25 = sshll.u32 %s1255_s27, 4  ;;  %s1108_s25 = int_to_ptr.vmem [resolvable:$false] %s1107_s25 }
 0x277   : > { %p1105_p4 = pnand %p1104_p3, %p1348_p9  ;;  %s1109_s11 = scalar_lea.vmem %s1108_s25, 256 }
 0x278   : > { %p1110_p13 = scmp.lt.s32.totalorder %s621_s12, %s1108_s25  ;;  %p1111_p12 = scmp.lt.s32.totalorder %s1109_s11, %s1103_s20 }
 0x279   : > { %p1106_p10 = pneg %p1105_p4 }
 0x27a   : > { %p1112_p1 = por %p1111_p12, %p1110_p13 }
 0x27c   : > { %p1113_p2 = pnand %p1112_p1, %p1106_p10 }
 0x27e   : > { %1116 = shalt.err (!%p1113_p2)
}
 0x27f   : > { %s1117_s8 = scalar_lea.hbm %s618_s30, 128  ;;  %s1121_s15 = scalar_lea.hbm %s1598_s5, 256 }
 0x280   : > { %p1118_p5 = scmp.ne.s32.totalorder %s618_s30, %s1117_s8  ;;  %p1122_p8 = scmp.lt.s32.totalorder %s618_s30, %s1598_s5 }
 0x281   : > { %p1123_p0 = scmp.lt.s32.totalorder %s1121_s15, %s1117_s8 }
 0x282   : > { %p1119_p6 = pnand %p1118_p5, %p1348_p9 }
 0x283   : > { %p1124_p3 = por %p1123_p0, %p1122_p8 }
 0x284   : > { %p1120_p7 = pneg %p1119_p6 }
 0x286   : > { %p1125_p4 = pnand %p1124_p3, %p1120_p7 }
 0x288   : > { %1128 = shalt.err (!%p1125_p4)
}
 0x289   : > { %906 = dma.vmem_to_hbm [thread:$0]  (%p1348_p9), %s621_s12, 128, %s618_s30, %s1478_s18  }
 0x28a   : > { %s634_s17 = sshll.u32 %s388_s9, 4  ;;  %s578_s14 = scalar_lea.sflag [#allocation13], %s1434_s19  ;;  %s635_s17 = int_to_ptr.vmem [resolvable:$true] %s634_s17 }
 0x28b   : > { %s1129_s16 = scalar_lea.vmem %s635_s17, 128  ;;  %s1256_s20 = smov [#allocation12]  }
 0x28c   : > { %p1130_p10 = scmp.ne.s32.totalorder %s635_s17, %s1129_s16  ;;  %s1133_s27 = sshll.u32 %s1256_s20, 4  ;;  %s1134_s27 = int_to_ptr.vmem [resolvable:$false] %s1133_s27 }
 0x28d   : > { %s1135_s25 = scalar_lea.vmem %s1134_s27, 256  ;;  %p1136_p1 = scmp.lt.s32.totalorder %s635_s17, %s1134_s27 }
 0x28e   : > { %p1131_p13 = pnand %p1130_p10, %p1348_p9  ;;  %p1137_p2 = scmp.lt.s32.totalorder %s1135_s25, %s1129_s16 }
 0x290   : > { %p1132_p12 = pneg %p1131_p13  ;;  %p1138_p5 = por %p1137_p2, %p1136_p1 }
 0x292   : > { %p1139_p6 = pnand %p1138_p5, %p1132_p12 }
 0x294   : > { %1142 = shalt.err (!%p1139_p6)
}
 0x295   : > { %s1143_s9 = scalar_lea.hbm %s1503_s24, 128  ;;  %s1147_s12 = scalar_lea.hbm %s1599_s6, 256 }
 0x296   : > { %p1144_p7 = scmp.ne.s32.totalorder %s1503_s24, %s1143_s9  ;;  %p1148_p3 = scmp.lt.s32.totalorder %s1503_s24, %s1599_s6 }
 0x297   : > { %p1149_p4 = scmp.lt.s32.totalorder %s1147_s12, %s1143_s9 }
 0x298   : > { %p1145_p8 = pnand %p1144_p7, %p1348_p9 }
 0x299   : > { %p1150_p10 = por %p1149_p4, %p1148_p3 }
 0x29a   : > { %p1146_p0 = pneg %p1145_p8 }
 0x29c   : > { %p1151_p13 = pnand %p1150_p10, %p1146_p0 }
 0x29e   : > { %1154 = shalt.err (!%p1151_p13)
}
 0x29f   : > { %907 = dma.vmem_to_hbm [thread:$0]  (%p1348_p9), %s635_s17, 128, %s1503_s24, %s578_s14  }
 0x2a0   : > { %s367_s26 = scalar_lea.vmem [#allocation8], %s1437_s7  ;;  %s1542_s29 = scalar_lea.hbm %s1596_s3, %s1470_s1 }
 0x2a1   : > { %s592_s28 = sshll.u32 %s367_s26, 4  ;;  %s563_s16 = scalar_lea.sflag [#allocation4], %s1434_s19  ;;  %s1544_s28 = int_to_ptr.vmem [resolvable:$true] %s592_s28 }
 0x2a2   : > { %s1155_s20 = scalar_lea.vmem %s1544_s28, 128  ;;  %s1257_s7 = smov [#allocation8]  }
 0x2a3   : > { %p1156_p12 = scmp.ne.s32.totalorder %s1544_s28, %s1155_s20  ;;  %s1159_s24 = sshll.u32 %s1257_s7, 4  ;;  %s1160_s24 = int_to_ptr.vmem [resolvable:$false] %s1159_s24 }
 0x2a4   : > { %s1161_s1 = scalar_lea.vmem %s1160_s24, 256  ;;  %p1162_p5 = scmp.lt.s32.totalorder %s1544_s28, %s1160_s24 }
 0x2a5   : > { %p1157_p1 = pnand %p1156_p12, %p1348_p9  ;;  %p1163_p6 = scmp.lt.s32.totalorder %s1161_s1, %s1155_s20 }
 0x2a7   : > { %p1158_p2 = pneg %p1157_p1  ;;  %p1164_p7 = por %p1163_p6, %p1162_p5 }
 0x2a9   : > { %p1165_p8 = pnand %p1164_p7, %p1158_p2 }
 0x326   : > { %v557_v19 = vpop.f32.mrf.mxu1 }
 0x327   : > { %561 = vst.msk [vmem:[%s367_s26] sm:$0xff] %vm392_vm1, %v557_v19 }
 0x328   : > { %v897_v20 = vpop.f32.mrf.mxu1 }
 0x329   : > { %1168 = shalt.err (!%p1165_p8)
}
 0x32a   : > { %s1169_s17 = scalar_lea.hbm %s1542_s29, 128  ;;  %s1173_s27 = scalar_lea.hbm %s1596_s3, 256 }
 0x32b   : > { %p1170_p0 = scmp.ne.s32.totalorder %s1542_s29, %s1169_s17  ;;  %p1174_p10 = scmp.lt.s32.totalorder %s1542_s29, %s1596_s3 }
 0x32c   : > { %p1175_p13 = scmp.lt.s32.totalorder %s1173_s27, %s1169_s17 }
 0x32d   : > { %p1171_p3 = pnand %p1170_p0, %p1348_p9 }
 0x32e   : > { %p1176_p12 = por %p1175_p13, %p1174_p10 }
 0x32f   : > { %p1172_p4 = pneg %p1171_p3 }
 0x331   : > { %p1177_p1 = pnand %p1176_p12, %p1172_p4 }
 0x333   : > { %1180 = shalt.err (!%p1177_p1)
}
 0x334   : > { %904 = dma.vmem_to_hbm [thread:$0]  (%p1348_p9), %s1544_s28, 128, %s1542_s29, %s563_s16  }
 0x335 PF: > { %s1622_s30 = sld [smem:[#allocation20_spill]]  ;;  %s646_s12 = sand.u32 1, %s1227_s21  }
 0x336   : > { %s647_s11 = scalar_lea.sflag [#allocation4], %s646_s12 }
 0x33b   : > { %p1623_p2 = scmp.ge.s32.totalorder %s1622_s30, 2 }
 0x33d   : > { %p923_p5 = pnand %p1623_p2, %p1357_p11 }
 0x33f   : > { %p924_p6 = pneg %p923_p5 }
 0x341   : > { %1214 = dma.done.wait (%p924_p6), %s647_s11, 128  }
 0x342   : > { %1216 = vsyncadd (%p924_p6), %s647_s11, 4294967168  ;;  %s1624_s8 = sadd.s32 4294967294, %s1622_s30  }
 0x343   : > { %s655_s26 = sand.u32 1, %s1624_s8  }
 0x344   : > { %s656_s15 = scalar_lea.sflag [#allocation10], %s655_s26 }
 0x345   : > { %1218 = dma.done.wait (%p924_p6), %s656_s15, 256  }
 0x346   : > { %1220 = vsyncadd (%p924_p6), %s656_s15, 4294967040  ;;  %s674_s10 = scalar_lea.sflag [#allocation13], %s646_s12 }
 0x347   : > { %1222 = dma.done.wait (%p924_p6), %s674_s10, 128  }
 0x348   : > { %1224 = vsyncadd (%p924_p6), %s674_s10, 4294967168  ;;  %s32_s26 = sadd.s32 1, %s1622_s30   ;;  %s1625_s28 = sld [smem:[#allocation22_spill]] }
 0x349   : > { %p29_p9 = scmp.ge.s32.totalorder %s32_s26, 4   ;;  %s1626_s24 = sld [smem:[#allocation19_spill]] }
 0x34a   : > { %s1627_s25 = sld [smem:[#allocation21_spill]]  ;;  %s1628_s21 = smov %s1231_s22 }
 0x34b   : > { %s1629_s22 = smov %s1235_s23  ;;  %31 = sbr.rel (!%p29_p9) target bundleno = 14 (0xe), region = 150 }
 0x34e   : > { %s1630_s23 = smov %s1625_s28 }
 0x350   :  { %679 = vsyncpa [#allocation3], 1 }
 0x351   :  { %681 = vsyncpa [#allocation3 + $0x1], 1 }
 0x352   :  { %682 = vsyncpa [#allocation6], 1 }
 0x353   :  { %684 = vsyncpa [#allocation6 + $0x1], 1 }
 0x354   :  { %685 = vsyncpa [#allocation4], 1 }
 0x355   :  { %687 = vsyncpa [#allocation4 + $0x1], 1 }
 0x356   :  { %688 = vsyncpa [#allocation10], 1 }
 0x357   :  { %690 = vsyncpa [#allocation10 + $0x1], 1 }
 0x358   :  { %691 = vsyncpa [#allocation13], 1 }
 0x359   :  { %693 = vsyncpa [#allocation13 + $0x1], 1 }

</bundles_post_ra>
